<compile_context>
chip_gen: v7x
topology: tpu7x:2x2x1
jax: 0.10.0
libtpu: 0.0.40
codegen_flags: <defaults>
</compile_context>

<pallas_src>
import functools

import jax
import jax.numpy as jnp
from jax.experimental import pallas as pl
from jax.experimental.pallas import tpu as pltpu


def _ce_kernel(x_ref, t_ref, w_ref, num_ref, den_ref, cnt_ref, *,
               hw, tile_p, needs_mask):
    """One (image, pixel-tile) grid cell.

    x_ref : (C, TP)  logits, classes on sublanes, pixels on lanes
    t_ref : (1, TP)  raw targets in [0, C] (int32)
    w_ref : (C, 1)   class weights (f32)
    num_ref, den_ref, cnt_ref : (1, 1) f32 per-tile partials
    """
    x = x_ref[...].astype(jnp.float32)          # (C, TP)
    t_raw = t_ref[...]                          # (1, TP)
    w = w_ref[...]                              # (C, 1)
    c, tp = x.shape

    if needs_mask:
        # Tail tile of the pixel axis may read past H*W: mask garbage in-kernel.
        j = pl.program_id(1)
        pix = j * tile_p + jax.lax.broadcasted_iota(jnp.int32, (1, tp), 1)
        valid = pix < hw                        # (1, TP) bool
        x = jnp.where(valid, x, 0.0)
        t_raw = jnp.where(valid, t_raw, 0)

    has_fg = t_raw > 0                          # original-target mask (targets > 0)
    t = jnp.where(has_fg, t_raw - 1, t_raw)     # PyTorch target shift

    # Numerically stable log-softmax over the class (sublane) axis; reuse xs.
    m = jnp.max(x, axis=0, keepdims=True)       # (1, TP)
    xs = x - m                                  # (C, TP)
    lse = jnp.log(jnp.sum(jnp.exp(xs), axis=0, keepdims=True))   # (1, TP)

    cls = jax.lax.broadcasted_iota(jnp.int32, (c, tp), 0)
    onehot = (cls == t).astype(jnp.float32)                      # (C, TP)
    xs_t = jnp.sum(onehot * xs, axis=0, keepdims=True)           # (1, TP) shifted target logit
    w_t = jnp.sum(onehot * w, axis=0, keepdims=True)             # (1, TP) weight[target]
    if needs_mask:
        w_t = jnp.where(valid, w_t, 0.0)

    nll = lse - xs_t                                             # -log p[target]
    num_ref[...] = jnp.sum(w_t * nll, keepdims=True)             # (1, 1)
    den_ref[...] = jnp.sum(w_t, keepdims=True)
    cnt_ref[...] = jnp.sum(has_fg.astype(jnp.float32), keepdims=True)


def _pick_tile_p(hw, c, itemsize, tile_p_max, budget_bytes=8 << 20):
    """Largest multiple-of-128 pixel tile whose double-buffered logits stream fits
    the per-buffer VMEM budget; uses the full pixel row when it already fits
    (block == full dim is always a legal TPU block shape)."""
    by_budget = budget_bytes // max(1, 2 * c * itemsize)
    tp = int(min(tile_p_max, by_budget))
    tp = max(128, (tp // 128) * 128)
    if hw <= tp:
        return hw
    return tp


def cross_entropy_loss_2d(inputs, targets, weight=None, *, tile_p_max=4096):
    """inputs: (N, C, H, W) float; targets: (N, H, W) int in [0, C]; weight: (C,) or None."""
    n, c, h, w_sp = inputs.shape
    hw = h * w_sp
    if weight is None:
        weight = jnp.ones((c,), jnp.float32)

    tile_p = _pick_tile_p(hw, c, jnp.dtype(inputs.dtype).itemsize, tile_p_max)
    t_hw = int(pl.cdiv(hw, tile_p))
    needs_mask = (hw % tile_p) != 0

    # Layout-preserving reshapes only: no transpose, no pad, no where in the wrapper.
    x3 = inputs.reshape(n, c, hw)                       # (N, C, HW)
    t3 = targets.reshape(n, 1, hw).astype(jnp.int32)    # (N, 1, HW)
    w2 = weight.astype(jnp.float32).reshape(c, 1)       # (C, 1)

    kernel = functools.partial(_ce_kernel, hw=hw, tile_p=tile_p,
                               needs_mask=needs_mask)

    part_shape = jax.ShapeDtypeStruct((n, t_hw, 1, 1), jnp.float32)
    part_spec = pl.BlockSpec((None, None, 1, 1), lambda i, j: (i, j, 0, 0))

    num_p, den_p, cnt_p = pl.pallas_call(
        kernel,
        out_shape=(part_shape, part_shape, part_shape),
        grid_spec=pltpu.PrefetchScalarGridSpec(
            num_scalar_prefetch=0,
            grid=(n, t_hw),
            in_specs=[
                pl.BlockSpec((None, c, tile_p), lambda i, j: (i, 0, j)),   # logits tile
                pl.BlockSpec((None, 1, tile_p), lambda i, j: (i, 0, j)),   # raw targets tile
                pl.BlockSpec((c, 1), lambda i, j: (0, 0)),                 # class weights
            ],
            out_specs=(part_spec, part_spec, part_spec),
        ),
        compiler_params=pltpu.CompilerParams(
            dimension_semantics=("parallel", "parallel"),
            vmem_limit_bytes=32 * 1024 * 1024,
        ),
    )(x3, t3, w2)

    num = jnp.sum(num_p)
    den = jnp.sum(den_p)
    cnt = jnp.sum(cnt_p)
    loss_all = num / den
    # Original module: masked_select on the scalar loss, then / sum(mask).
    # Identity unless no pixel has target > 0 (PyTorch -> 0/0 = nan).
    return jnp.where(cnt > 0, loss_all, jnp.float32(jnp.nan))


def _reference(inputs, targets, weight):
    """Pure-JAX reference of the PyTorch forward (for correctness check)."""
    _, c, _, _ = inputs.shape
    x = jnp.transpose(inputs, (0, 2, 3, 1)).reshape(-1, c).astype(jnp.float32)
    t = targets.reshape(-1).astype(jnp.int32)
    t_m = jnp.where(t > 0, t - 1, t)
    logp = jax.nn.log_softmax(x, axis=-1)
    nll = -jnp.take_along_axis(logp, t_m[:, None], axis=-1)[:, 0]
    w_t = weight[t_m]
    loss_all = jnp.sum(w_t * nll) / jnp.sum(w_t)
    mask_cnt = jnp.sum((t > 0).astype(jnp.float32))
    return jnp.where(mask_cnt > 0, loss_all, jnp.float32(jnp.nan))


if __name__ == "__main__":
    key = jax.random.PRNGKey(0)
    k_in, k_tg, k_w, k_in2, k_tg2 = jax.random.split(key, 5)

    # Test 1: weighted, single full pixel tile per image.
    N, C, H, W = 2, 4, 16, 16
    inputs = jax.random.normal(k_in, (N, C, H, W), dtype=jnp.float32)
    # targets in [0, C]: 0 keeps class 0 after the shift, 1..C map to 0..C-1.
    targets = jax.random.randint(k_tg, (N, H, W), 0, C + 1, dtype=jnp.int32)
    weight = jax.random.uniform(k_w, (C,), minval=0.5, maxval=1.5, dtype=jnp.float32)

    loss = jax.block_until_ready(cross_entropy_loss_2d(inputs, targets, weight))
    ref = _reference(inputs, targets, weight)
    assert jnp.allclose(loss, ref, rtol=1e-5, atol=1e-5), (loss, ref)

    # Test 2: HW not a multiple of the (forced-small) tile -> exercises the
    # in-kernel tail-masking path; also the weight=None branch of the module.
    N2, C2, H2, W2 = 1, 5, 16, 20        # HW = 320, tile_p forced to 128 -> 3 tiles
    inputs2 = jax.random.normal(k_in2, (N2, C2, H2, W2), dtype=jnp.float32)
    targets2 = jax.random.randint(k_tg2, (N2, H2, W2), 0, C2 + 1, dtype=jnp.int32)
    loss2 = jax.block_until_ready(
        cross_entropy_loss_2d(inputs2, targets2, None, tile_p_max=128))
    ref2 = _reference(inputs2, targets2, jnp.ones((C2,), jnp.float32))
    assert jnp.allclose(loss2, ref2, rtol=1e-5, atol=1e-5), (loss2, ref2)

    print("KERNEL_OK")
</pallas_src>

<mosaic_0001>
module attributes {stable_mosaic.version = 11 : i64} {
  func.func @_ce_kernel(%arg0: i32, %arg1: i32, %arg2: memref<1x4x256xf32, #tpu.memory_space<vmem>>, %arg3: memref<1x1x256xi32, #tpu.memory_space<vmem>>, %arg4: memref<4x1xf32, #tpu.memory_space<vmem>>, %arg5: memref<1x1x1x1xf32, #tpu.memory_space<vmem>>, %arg6: memref<1x1x1x1xf32, #tpu.memory_space<vmem>>, %arg7: memref<1x1x1x1xf32, #tpu.memory_space<vmem>>) attributes {dimension_semantics = [#tpu.dimension_semantics<parallel>, #tpu.dimension_semantics<parallel>], iteration_bounds = array<i64: 2, 1>, scalar_prefetch = 0 : i64, scratch_operands = 0 : i64, tpu.core_type = #tpu.core_type<tc>, window_params = [{transform_indices = @transform_0, window_bounds = array<i64: 1, 4, 256>}, {transform_indices = @transform_1, window_bounds = array<i64: 1, 1, 256>}, {pipeline_mode = #tpu.pipeline_mode<synchronous>, transform_indices = @transform_2, window_bounds = array<i64: 4, 1>}, {transform_indices = @transform_3, window_bounds = array<i64: 1, 1, 1, 1>}, {transform_indices = @transform_4, window_bounds = array<i64: 1, 1, 1, 1>}, {transform_indices = @transform_5, window_bounds = array<i64: 1, 1, 1, 1>}]} {
    %c0 = arith.constant 0 : index
    %c0_0 = arith.constant 0 : index
    %c0_1 = arith.constant 0 : index
    %0 = vector.load %arg2[%c0, %c0_0, %c0_1] : memref<1x4x256xf32, #tpu.memory_space<vmem>>, vector<1x4x256xf32>
    %1 = vector.shape_cast %0 : vector<1x4x256xf32> to vector<4x256xf32>
    %c0_2 = arith.constant 0 : index
    %c0_3 = arith.constant 0 : index
    %c0_4 = arith.constant 0 : index
    %2 = vector.load %arg3[%c0_2, %c0_3, %c0_4] : memref<1x1x256xi32, #tpu.memory_space<vmem>>, vector<1x1x256xi32>
    %3 = vector.shape_cast %2 : vector<1x1x256xi32> to vector<1x256xi32>
    %c0_5 = arith.constant 0 : index
    %c0_6 = arith.constant 0 : index
    %4 = vector.load %arg4[%c0_5, %c0_6] : memref<4x1xf32, #tpu.memory_space<vmem>>, vector<4x1xf32>
    %c0_i32 = arith.constant 0 : i32
    %5 = vector.broadcast %c0_i32 : i32 to vector<1x256xi32>
    %6 = arith.cmpi sgt, %3, %5 : vector<1x256xi32>
    %c1_i32 = arith.constant 1 : i32
    %7 = vector.broadcast %c1_i32 : i32 to vector<1x256xi32>
    %8 = arith.subi %3, %7 : vector<1x256xi32>
    %9 = arith.select %6, %8, %3 : vector<1x256xi1>, vector<1x256xi32>
    %cst = arith.constant dense<0xFF800000> : vector<256xf32>
    %10 = vector.multi_reduction <maximumf>, %1, %cst [0] : vector<4x256xf32> to vector<256xf32>
    %11 = vector.shape_cast %10 : vector<256xf32> to vector<1x256xf32>
    %12 = vector.broadcast %11 : vector<1x256xf32> to vector<4x256xf32>
    %13 = arith.subf %1, %12 : vector<4x256xf32>
    %14 = math.exp %13 : vector<4x256xf32>
    %cst_7 = arith.constant dense<0.000000e+00> : vector<256xf32>
    %15 = vector.multi_reduction <add>, %14, %cst_7 [0] : vector<4x256xf32> to vector<256xf32>
    %16 = vector.shape_cast %15 : vector<256xf32> to vector<1x256xf32>
    %17 = math.log %16 : vector<1x256xf32>
    %18 = tpu.iota {dimensions = array<i32: 0>} : vector<4x256xi32>
    %19 = vector.broadcast %9 : vector<1x256xi32> to vector<4x256xi32>
    %20 = arith.cmpi eq, %18, %19 : vector<4x256xi32>
    %21 = arith.extui %20 : vector<4x256xi1> to vector<4x256xi32>
    %22 = arith.sitofp %21 : vector<4x256xi32> to vector<4x256xf32>
    %23 = arith.mulf %22, %13 : vector<4x256xf32>
    %cst_8 = arith.constant dense<0.000000e+00> : vector<256xf32>
    %24 = vector.multi_reduction <add>, %23, %cst_8 [0] : vector<4x256xf32> to vector<256xf32>
    %25 = vector.shape_cast %24 : vector<256xf32> to vector<1x256xf32>
    %26 = vector.broadcast %4 : vector<4x1xf32> to vector<4x256xf32>
    %27 = arith.mulf %22, %26 : vector<4x256xf32>
    %cst_9 = arith.constant dense<0.000000e+00> : vector<256xf32>
    %28 = vector.multi_reduction <add>, %27, %cst_9 [0] : vector<4x256xf32> to vector<256xf32>
    %29 = vector.shape_cast %28 : vector<256xf32> to vector<1x256xf32>
    %30 = arith.subf %17, %25 : vector<1x256xf32>
    %31 = arith.mulf %29, %30 : vector<1x256xf32>
    %32 = vector.shape_cast %31 : vector<1x256xf32> to vector<1x1x256xf32>
    %cst_10 = arith.constant dense<0.000000e+00> : vector<1xf32>
    %33 = vector.multi_reduction <add>, %32, %cst_10 [1, 2] : vector<1x1x256xf32> to vector<1xf32>
    %34 = vector.shape_cast %33 : vector<1xf32> to vector<1x1x1xf32>
    %35 = vector.extract %34[0, 0, 0] : f32 from vector<1x1x1xf32>
    %36 = vector.broadcast %35 : f32 to vector<1x1xf32>
    %c0_11 = arith.constant 0 : index
    %c0_12 = arith.constant 0 : index
    %c0_13 = arith.constant 0 : index
    %c0_14 = arith.constant 0 : index
    %37 = vector.load %arg5[%c0_11, %c0_12, %c0_13, %c0_14] : memref<1x1x1x1xf32, #tpu.memory_space<vmem>>, vector<1x1x1x1xf32>
    %38 = vector.shape_cast %37 : vector<1x1x1x1xf32> to vector<1x1xf32>
    %39 = vector.shape_cast %36 : vector<1x1xf32> to vector<1x1x1x1xf32>
    tpu.vector_store %arg5[%c0_11, %c0_12, %c0_13, %c0_14], %39 {strides = array<i32>} : memref<1x1x1x1xf32, #tpu.memory_space<vmem>>, vector<1x1x1x1xf32>,
    %40 = vector.shape_cast %29 : vector<1x256xf32> to vector<1x1x256xf32>
    %cst_15 = arith.constant dense<0.000000e+00> : vector<1xf32>
    %41 = vector.multi_reduction <add>, %40, %cst_15 [1, 2] : vector<1x1x256xf32> to vector<1xf32>
    %42 = vector.shape_cast %41 : vector<1xf32> to vector<1x1x1xf32>
    %43 = vector.extract %42[0, 0, 0] : f32 from vector<1x1x1xf32>
    %44 = vector.broadcast %43 : f32 to vector<1x1xf32>
    %c0_16 = arith.constant 0 : index
    %c0_17 = arith.constant 0 : index
    %c0_18 = arith.constant 0 : index
    %c0_19 = arith.constant 0 : index
    %45 = vector.load %arg6[%c0_16, %c0_17, %c0_18, %c0_19] : memref<1x1x1x1xf32, #tpu.memory_space<vmem>>, vector<1x1x1x1xf32>
    %46 = vector.shape_cast %45 : vector<1x1x1x1xf32> to vector<1x1xf32>
    %47 = vector.shape_cast %44 : vector<1x1xf32> to vector<1x1x1x1xf32>
    tpu.vector_store %arg6[%c0_16, %c0_17, %c0_18, %c0_19], %47 {strides = array<i32>} : memref<1x1x1x1xf32, #tpu.memory_space<vmem>>, vector<1x1x1x1xf32>,
    %48 = arith.extui %6 : vector<1x256xi1> to vector<1x256xi32>
    %49 = arith.sitofp %48 : vector<1x256xi32> to vector<1x256xf32>
    %50 = vector.shape_cast %49 : vector<1x256xf32> to vector<1x1x256xf32>
    %cst_20 = arith.constant dense<0.000000e+00> : vector<1xf32>
    %51 = vector.multi_reduction <add>, %50, %cst_20 [1, 2] : vector<1x1x256xf32> to vector<1xf32>
    %52 = vector.shape_cast %51 : vector<1xf32> to vector<1x1x1xf32>
    %53 = vector.extract %52[0, 0, 0] : f32 from vector<1x1x1xf32>
    %54 = vector.broadcast %53 : f32 to vector<1x1xf32>
    %c0_21 = arith.constant 0 : index
    %c0_22 = arith.constant 0 : index
    %c0_23 = arith.constant 0 : index
    %c0_24 = arith.constant 0 : index
    %55 = vector.load %arg7[%c0_21, %c0_22, %c0_23, %c0_24] : memref<1x1x1x1xf32, #tpu.memory_space<vmem>>, vector<1x1x1x1xf32>
    %56 = vector.shape_cast %55 : vector<1x1x1x1xf32> to vector<1x1xf32>
    %57 = vector.shape_cast %54 : vector<1x1xf32> to vector<1x1x1x1xf32>
    tpu.vector_store %arg7[%c0_21, %c0_22, %c0_23, %c0_24], %57 {strides = array<i32>} : memref<1x1x1x1xf32, #tpu.memory_space<vmem>>, vector<1x1x1x1xf32>,
    return
  }
  func.func @transform_0(%arg0: i32, %arg1: i32) -> (i32, i32, i32) {
    %c0_i32 = arith.constant 0 : i32
    %c0_i32_0 = arith.constant 0 : i32
    return %arg0, %c0_i32, %arg1 : i32, i32, i32
  }
  func.func @transform_1(%arg0: i32, %arg1: i32) -> (i32, i32, i32) {
    %c0_i32 = arith.constant 0 : i32
    %c0_i32_0 = arith.constant 0 : i32
    return %arg0, %c0_i32, %arg1 : i32, i32, i32
  }
  func.func @transform_2(%arg0: i32, %arg1: i32) -> (i32, i32) {
    %c0_i32 = arith.constant 0 : i32
    %c0_i32_0 = arith.constant 0 : i32
    %c0_i32_1 = arith.constant 0 : i32
    return %c0_i32, %c0_i32_0 : i32, i32
  }
  func.func @transform_3(%arg0: i32, %arg1: i32) -> (i32, i32, i32, i32) {
    %c0_i32 = arith.constant 0 : i32
    %c0_i32_0 = arith.constant 0 : i32
    %c0_i32_1 = arith.constant 0 : i32
    return %arg0, %arg1, %c0_i32, %c0_i32_0 : i32, i32, i32, i32
  }
  func.func @transform_4(%arg0: i32, %arg1: i32) -> (i32, i32, i32, i32) {
    %c0_i32 = arith.constant 0 : i32
    %c0_i32_0 = arith.constant 0 : i32
    %c0_i32_1 = arith.constant 0 : i32
    return %arg0, %arg1, %c0_i32, %c0_i32_0 : i32, i32, i32, i32
  }
  func.func @transform_5(%arg0: i32, %arg1: i32) -> (i32, i32, i32, i32) {
    %c0_i32 = arith.constant 0 : i32
    %c0_i32_0 = arith.constant 0 : i32
    %c0_i32_1 = arith.constant 0 : i32
    return %arg0, %arg1, %c0_i32, %c0_i32_0 : i32, i32, i32, i32
  }
}

</mosaic_0001>

<bundles_post_ra>
// kernel: tpu_custom_call.1
= control target key start
LH: loop header
LB: loop body
LE: loop exit
PB: predicated region body
PF: predicated region fallthrough
CT: control target
= control target key end

     0   :  { %11 = vsyncpa [#allocation3], 0  ;;  %s1026_s0 = inlined_call_operand.hbm [shape: f32[2,4,256], index: 0, kind: input, shape index: {}]   ;;  %s1027_s1 = inlined_call_operand.vmem [shape: s32[2,1,256], index: 1, kind: input, shape index: {}]   ;;  %s1028_s2 = inlined_call_operand.vmem [shape: f32[4,1], index: 2, kind: input, shape index: {}]   ;;  %s1029_s3 = inlined_call_operand.vmem [shape: f32[2,1,1,1], index: 3, kind: output, shape index: {0}]   ;;  %s1030_s4 = inlined_call_operand.vmem [shape: f32[2,1,1,1], index: 4, kind: output, shape index: {1}]   ;;  %s1031_s5 = inlined_call_operand.vmem [shape: f32[2,1,1,1], index: 5, kind: output, shape index: {2}]  }
   0x1   :  { %13 = vsyncpa [#allocation3 + $0x1], 0  ;;  %s867_s18 = smov 0   ;;  %s869_s19 = smov 0  }
   0x2   :  { %s871_s20 = smov 0   ;;  %s873_s21 = smov 0  }
   0x3   :  { %s875_s22 = smov 0   ;;  %s877_s23 = smov 0  }
   0x4 LB: > { %s664_s24 = sadd.s32 4294967295, %s832_s23   ;;  %s31_s25 = sadd.s32 1, %s828_s22  ;;  %s832_s23 = sphi %s877_s23, %s19_s23   ;;  %s828_s22 = sphi %s875_s22, %s1041_s22   ;;  %s824_s21 = sphi %s873_s21, %s1040_s21   ;;  %s820_s20 = sphi %s871_s20, %s1039_s20   ;;  %s816_s19 = sphi %s869_s19, %s1038_s19   ;;  %s812_s18 = sphi %s867_s18, %s1037_s18  }
   0x5   : > { %p33_p0 = scmp.ge.s32.totalorder %s31_s25, 2  ;;  %s40_s26 = sadd.s32 1, %s820_s20 }
   0x6   : > { %p47_p1 = scmp.ne.s32.totalorder %s820_s20, %s816_s19  ;;  %p48_p2 = scmp.eq.s32.totalorder %s832_s23, 0 }
   0x7   : > { %s1043_s25 = smov (%p33_p0, %s31_s25), 0  ;;  %p53_p4 = scmp.ne.s32.totalorder %s816_s19, %s812_s18 }
   0x8   : > { %p903_p3 = por %p48_p2, %p47_p1  ;;  %s35_s28 = ssub.s32 %s828_s22, %s1043_s25 }
   0x9   : > { %p54_p5 = scmp.eq.s32.totalorder %s664_s24, 0  ;;  %p38_p6 = scmp.eq.s32.totalorder %s35_s28, 0 }
   0xa   : > { %p693_p8 = scmp.lt.s32.totalorder %s832_s23, 2  ;;  %s213_s6 = sand.u32 1, %s820_s20  }
   0xb   : > { %p910_p7 = por %p54_p5, %p53_p4  ;;  %s680_s7 = sshll.u32 %s828_s22, 7 }
   0xc   : > { %s916_s30 = scalar_select %p38_p6, %s820_s20, %s40_s26  }
   0xd   : > { %s668_s8 = sshll.u32 %s213_s6, 3  ;;  %s923_s11 = scalar_lea.hbm %s1026_s0, %s680_s7 }
   0xe   : > { %s217_s12 = scalar_lea.vmem [#allocation2], %s668_s8  ;;  %p927_p9 = pnand %p693_p8, %p903_p3 }
   0xf   : > { %s227_s13 = sshll.u32 %s217_s12, 4  ;;  %s214_s15 = scalar_lea.sflag [#allocation3], %s213_s6  ;;  %s931_s13 = int_to_ptr.vmem [resolvable:$true] %s227_s13 }
  0x10   : > { %s752_s16 = scalar_lea.hbm %s923_s11, 128  ;;  %p754_p13 = pneg %p927_p9 }
  0x11   : > { %p753_p12 = scmp.ne.s32.totalorder %s923_s11, %s752_s16  ;;  %s757_s24 = scalar_lea.hbm %s1026_s0, 256 }
  0x12   : > { %p758_p2 = scmp.lt.u32.totalorder %s923_s11, %s1026_s0  ;;  %p759_p3 = scmp.lt.u32.totalorder %s757_s24, %s752_s16 }
  0x13   : > { %p755_p0 = pnand %p754_p13, %p753_p12  ;;  %p761_p5 = scmp.lt.u32.totalorder %s752_s16, %s923_s11 }
  0x14   : > { %p760_p4 = por %p759_p3, %p758_p2 }
  0x15   : > { %p756_p1 = pneg %p755_p0 }
  0x16   : > { %p762_p6 = por %p761_p5, %p760_p4 }
  0x18   : > { %p763_p8 = pnand %p762_p6, %p756_p1 }
  0x1a   : > { %766 = shalt.err (!%p763_p8)
}
  0x1b   : > { %s767_s28 = scalar_lea.vmem %s931_s13, 128  ;;  %s834_s6 = smov [#allocation2]  }
  0x1c   : > { %p768_p12 = scmp.ne.s32.totalorder %s931_s13, %s767_s28  ;;  %s772_s7 = sshll.u32 %s834_s6, 4  ;;  %s773_s7 = int_to_ptr.vmem [resolvable:$false] %s772_s7 }
  0x1d   : > { %s774_s8 = scalar_lea.vmem %s773_s7, 256  ;;  %p775_p11 = scmp.lt.s32.totalorder %s931_s13, %s773_s7 }
  0x1e   : > { %p770_p0 = pnand %p768_p12, %p754_p13  ;;  %p776_p2 = scmp.lt.s32.totalorder %s774_s8, %s767_s28 }
  0x20   : > { %p771_p10 = pneg %p770_p0  ;;  %p777_p3 = por %p776_p2, %p775_p11 }
  0x22   : > { %p778_p4 = pnand %p777_p3, %p771_p10 }
  0x24   : > { %781 = shalt.err (!%p778_p4)
}
  0x25   : > { %692 = dma.hbm_to_vmem [thread:$0]  (!%p927_p9), %s923_s11, 128, %s931_s13, %s214_s15  }
  0x26   : > { %p1035_p1 = scmp.lt.s32.totalorder %s832_s23, 3  ;;  %p1036_p5 = scmp.ge.s32.totalorder %s832_s23, 1 }
  0x28   : > { %p245_p13 = pnand %p1036_p5, %p1035_p1 }
  0x29   : > { %s250_s9 = sand.u32 (!%p245_p13), 1, %s816_s19  }
  0x2a   : > { %248 = sbr.rel (%p245_p13) target bundleno = 408 (0x198), region = 32  ;;  %s672_s10 = sshll.u32 (!%p245_p13), %s250_s9, 3 }
  0x2b   : > { %s251_s12 = scalar_lea.sflag (!%p245_p13), [#allocation3], %s250_s9  ;;  %s254_s16 = scalar_lea.vmem (!%p245_p13), [#allocation2], %s672_s10 }
  0x31   : > { %807 = dma.done.wait (%p910_p7), %s251_s12, 128  }
  0x32   : > { %809 = vsyncadd (%p910_p7), %s251_s12, 4294967168  ;;  %v835_v0 = vmov 0   ;;  %v332_v1 = vld [vmem:[%s1028_s2] sm:$0xf]  ;;  %vm339_vm0 = vcmask 1043456   ;;  %p304_p7 = scmp.lt.s32.totalorder %s824_s21, 1  ;;  %v382_v21 = vlaneseq }
  0x33   : > { %744 = vset.pattern.permute.xlu0 %v835_v0  ;;  %v330_v2 = vld [vmem:[%s254_s16] sm:$0xff]  ;;  %v836_v39 = vmov 0.0   ;;  %vm442_vm4 = vcmask 1040384   ;;  %vm456_vm5 = vcmask 0  }
  0x34   : > { %419 = vperm.xlu0 %744, %v332_v1   ;;  %v337_v3 = vcombine.high %v330_v2, %v330_v2  ;;  %v340_v4 = vsel %vm339_vm0, %v330_v2, -inf  ;;  %s1045_s21 = smov (!%p304_p7, %s824_s21), 1  ;;  %v982_v24 = vshrl.u32 %v382_v21, 7 }
  0x35   : > { %v341_v6 = vrot.slane %v340_v4, 4  ;;  %s673_s29 = sshll.u32 %s1045_s21, 1  ;;  %s317_s26 = scalar_lea.vmem %s1029_s3, %s1045_s21 }
  0x36   : > { %v347_v5 = vsel %vm339_vm0, %v337_v3, -inf  ;;  %s310_s15 = scalar_lea.vmem %s1027_s1, %s673_s29  ;;  %v386_v27 = vsub.s32 0, %v982_v24  ;;  %v390_v28 = vsub.s32 1, %v982_v24  ;;  %s323_s7 = scalar_lea.vmem %s1030_s4, %s1045_s21 }
  0x37   : > { %v348_v7 = vrot.slane %v347_v5, 4  ;;  %v342_v8 = vmax.f32 %v340_v4, %v341_v6  ;;  %v331_v22 = vld [vmem:[%s310_s15] sm:$0x3]  ;;  %s329_s12 = scalar_lea.vmem %s1031_s5, %s1045_s21 }
  0x38   : > { %v674_v25 = vadd.s32 4294967295, %v331_v22  ;;  %vm333_vm1 = vcmp.gt.s32.totalorder %v331_v22, 0 }
  0x39   : > { %v349_v9 = vmax.f32 %v347_v5, %v348_v7  ;;  %v343_v10 = vrot.slane %v342_v8, 2 }
  0x3a   : > { %v335_v29 = vsel %vm333_vm1, %v674_v25, %v331_v22 }
  0x3b   : > { %v350_v11 = vrot.slane %v349_v9, 2  ;;  %v344_v12 = vmax.f32 %v342_v8, %v343_v10  ;;  %v387_v32 = vrot.slane %v335_v29, %v386_v27  ;;  %v391_v33 = vrot.slane %v335_v29, %v390_v28 }
  0x3d   : > { %v351_v13 = vmax.f32 %v349_v9, %v350_v11  ;;  %v345_v14 = vrot.slane %v344_v12, 1  ;;  %vm392_vm2 = vcmp.eq.s32.totalorder %v982_v24, %v387_v32  ;;  %vm393_vm3 = vcmp.eq.s32.totalorder %v982_v24, %v391_v33 }
  0x3e   : > { %v675_v40 = vsel %vm392_vm2, 1.0, %v836_v39  ;;  %v676_v41 = vsel %vm393_vm3, 1.0, %v836_v39 }
  0x3f   : > { %v352_v15 = vrot.slane %v351_v13, 1  ;;  %v346_v16 = vmax.f32 %v344_v12, %v345_v14 }
  0x41   : > { %v353_v17 = vmax.f32 %v351_v13, %v352_v15  ;;  %v677_v13 = vsel %vm333_vm1, 1.0, %v836_v39 }
  0x42   : > { %v482_v21 = vrot.slane %v677_v13, %v390_v28 }
  0x43   : > { %v356_v18 = vcombine.low %v346_v16, %v353_v17 }
  0x44   : > { %v486_v32 = vsel %vm442_vm4, %v482_v21, 0.0 }
  0x45   : > { %v358_v19 = vsub.f32 %v330_v2, %v356_v18 }
  0x47   : > { %v359_v20 = vmul.f32 1.442695, %v358_v19  ;;  %v399_v38 = vcombine.high %v358_v19, %v358_v19  ;;  %v401_v44 = vmul.f32 %v675_v40, %v358_v19 }
  0x49   : > { %746 = vpow2.f32 %v359_v20  ;;  %v402_v45 = vmul.f32 %v676_v41, %v399_v38  ;;  %v403_v48 = vsel %vm339_vm0, %v401_v44, 0.0  ;;  %v478_v20 = vrot.slane %v677_v13, %v386_v27 }
  0x4a   : > { %v404_v51 = vrot.slane %v403_v48, 4 }
  0x4b   : > { %v410_v49 = vsel %vm339_vm0, %v402_v45, 0.0 }
  0x4c   : > { %v411_v52 = vrot.slane %v410_v49, 4  ;;  %v405_v55 = vadd.f32 %v404_v51, %v403_v48 }
  0x4e   : > { %v412_v56 = vadd.f32 %v411_v52, %v410_v49  ;;  %v406_v58 = vrot.slane %v405_v55, 2 }
  0x50   : > { %v413_v59 = vrot.slane %v412_v56, 2  ;;  %v407_v60 = vadd.f32 %v406_v58, %v405_v55 }
  0x52   : > { %v414_v61 = vadd.f32 %v413_v59, %v412_v56  ;;  %v408_v3 = vrot.slane %v407_v60, 1 }
  0x53   : > { %v747_v23 = vpop.eup %746 }
  0x54   : > { %v362_v26 = vcombine.high %v747_v23, %v747_v23  ;;  %v364_v30 = vsel %vm339_vm0, %v747_v23, 0.0  ;;  %v415_v4 = vrot.slane %v414_v61, 1  ;;  %v409_v11 = vadd.f32 %v408_v3, %v407_v60 }
  0x55   : > { %v365_v34 = vrot.slane %v364_v30, 4 }
  0x56   : > { %v371_v31 = vsel %vm339_vm0, %v362_v26, 0.0  ;;  %v416_v12 = vadd.f32 %v415_v4, %v414_v61 }
  0x57   : > { %v372_v35 = vrot.slane %v371_v31, 4  ;;  %v366_v36 = vadd.f32 %v365_v34, %v364_v30 }
  0x59   : > { %v373_v37 = vadd.f32 %v372_v35, %v371_v31  ;;  %v367_v42 = vrot.slane %v366_v36, 2  ;;  %v485_v31 = vsel %vm442_vm4, %v478_v20, 0.0 }
  0x5a   : > { %v487_v27 = vadd.f32 %v486_v32, %v485_v31 }
  0x5b   : > { %v374_v43 = vrot.slane %v373_v37, 2  ;;  %v368_v46 = vadd.f32 %v367_v42, %v366_v36 }
  0x5d   : > { %v375_v47 = vadd.f32 %v374_v43, %v373_v37  ;;  %v369_v50 = vrot.slane %v368_v46, 1 }
  0x5f   : > { %v376_v53 = vrot.slane %v375_v47, 1  ;;  %v370_v54 = vadd.f32 %v369_v50, %v368_v46 }
  0x61   : > { %v377_v57 = vadd.f32 %v376_v53, %v375_v47  ;;  %748 = vlog2.f32 %v370_v54 }
  0x63   : > { %750 = vlog2.f32 %v377_v57 }
  0x6b   : > { %v749_v5 = vpop.eup %748 }
  0x6c   : > { %v379_v16 = vmul.f32 0.6931472, %v749_v5 }
  0x6d   : > { %v751_v8 = vpop.eup %750 }
  0x6e   : > { %v381_v17 = vmul.f32 0.6931472, %v751_v8  ;;  %v438_v25 = vsub.f32 %v379_v16, %v409_v11 }
  0x70   : > { %v439_v26 = vsub.f32 %v381_v17, %v416_v12 }
  0xb3   : > { %v420_v62 = vpop.permute.xlu0 %419 }
  0xb4   : > { %v422_v63 = vmul.f32 %v675_v40, %v420_v62  ;;  %v423_v0 = vmul.f32 %v676_v41, %v420_v62 }
  0xb6   : > { %v424_v1 = vsel %vm339_vm0, %v422_v63, 0.0  ;;  %v431_v2 = vsel %vm339_vm0, %v423_v0, 0.0 }
  0xb7   : > { %v425_v6 = vrot.slane %v424_v1, 4  ;;  %v432_v7 = vrot.slane %v431_v2, 4 }
  0xb9   : > { %v426_v9 = vadd.f32 %v425_v6, %v424_v1  ;;  %v433_v10 = vadd.f32 %v432_v7, %v431_v2 }
  0xbb   : > { %v427_v14 = vrot.slane %v426_v9, 2  ;;  %v434_v15 = vrot.slane %v433_v10, 2 }
  0xbd   : > { %v428_v18 = vadd.f32 %v427_v14, %v426_v9  ;;  %v435_v19 = vadd.f32 %v434_v15, %v433_v10 }
  0xbf   : > { %v429_v23 = vrot.slane %v428_v18, 1  ;;  %v436_v24 = vrot.slane %v435_v19, 1 }
  0xc1   : > { %v430_v29 = vadd.f32 %v429_v23, %v428_v18  ;;  %v437_v30 = vadd.f32 %v436_v24, %v435_v19 }
  0xc3   : > { %v458_v33 = vsel %vm442_vm4, %v430_v29, 0.0  ;;  %v459_v22 = vsel %vm442_vm4, %v437_v30, 0.0  ;;  %v440_v34 = vmul.f32 %v438_v25, %v430_v29  ;;  %v441_v35 = vmul.f32 %v439_v26, %v437_v30 }
  0xc4   : > { %v460_v36 = vadd.f32 %v459_v22, %v458_v33 }
  0xc5   : > { %v443_v37 = vsel %vm442_vm4, %v440_v34, 0.0  ;;  %v444_v38 = vsel %vm442_vm4, %v441_v35, 0.0 }
  0xc6   : > { %461 = vadd.xlane.f32.xlu1 %v460_v36  ;;  %v445_v39 = vadd.f32 %v444_v38, %v443_v37 }
  0xc8   : > { %446 = vadd.xlane.f32.xlu0 %v445_v39 }
  0xca   : > { %488 = vadd.xlane.f32.xlu1 %v487_v27 }
 0x153   : > { %v462_v28 = vpop.xlane.xlu1 %461 }
 0x154   : > { %v463_v40 = vrot.slane %v462_v28, 4 }
 0x155   : > { %v447_v41 = vpop.xlane.xlu0 %446 }
 0x156   : > { %v464_v42 = vadd.f32 %v463_v40, %v462_v28  ;;  %v448_v43 = vrot.slane %v447_v41, 4 }
 0x157   : > { %v489_v44 = vpop.xlane.xlu1 %488 }
 0x158   : > { %v465_v45 = vrot.slane %v464_v42, 2  ;;  %v449_v46 = vadd.f32 %v448_v43, %v447_v41  ;;  %v490_v47 = vrot.slane %v489_v44, 4 }
 0x15a   : > { %v450_v48 = vrot.slane %v449_v46, 2  ;;  %v491_v49 = vadd.f32 %v490_v47, %v489_v44  ;;  %v466_v50 = vadd.f32 %v465_v45, %v464_v42 }
 0x15c   : > { %v492_v51 = vrot.slane %v491_v49, 2  ;;  %v451_v52 = vadd.f32 %v450_v48, %v449_v46  ;;  %v467_v53 = vrot.slane %v466_v50, 1 }
 0x15e   : > { %v493_v54 = vadd.f32 %v492_v51, %v491_v49  ;;  %v452_v55 = vrot.slane %v451_v52, 1  ;;  %v468_v58 = vadd.f32 %v467_v53, %v466_v50 }
 0x160   : > { %v453_v56 = vadd.f32 %v452_v55, %v451_v52  ;;  %v494_v57 = vrot.slane %v493_v54, 1 }
 0x162   : > { %681 = vpush %v453_v56  ;;  %v495_v59 = vadd.f32 %v494_v57, %v493_v54 }
 0x163   : > { %683 = vpush %v468_v58 }
 0x164   : > { %685 = vpush %v495_v59 }
 0x193   : > { %s682_s27 = spop %681 }
 0x194   : > { %v455_v60 = vstv %s682_s27  ;;  %s684_s8 = spop %683 }
 0x195   : > { %457 = vst.msk [vmem:[%s317_s26] sm:$0x1] %vm456_vm5, %v455_v60  ;;  %v470_v61 = vstv %s684_s8  ;;  %s686_s16 = spop %685 }
 0x196   : > { %471 = vst.msk [vmem:[%s323_s7] sm:$0x1] %vm456_vm5, %v470_v61  ;;  %v497_v62 = vstv %s686_s16 }
 0x197   : > { %498 = vst.msk [vmem:[%s329_s12] sm:$0x1] %vm456_vm5, %v497_v62 }
 0x198 PF: > { %s19_s23 = sadd.s32 1, %s832_s23   ;;  %s1037_s18 = smov %s816_s19 }
 0x199   : > { %p16_p9 = scmp.ge.s32.totalorder %s19_s23, 4   ;;  %s1038_s19 = smov %s820_s20 }
 0x19a   : > { %s1039_s20 = smov %s916_s30  ;;  %s1040_s21 = smov %s828_s22 }
 0x19b   : > { %s1041_s22 = smov %s1043_s25  ;;  %18 = sbr.rel (!%p16_p9) target bundleno = 4 (0x4), region = 99 }
 0x1a2   :  { %558 = vsyncpa [#allocation3], 1 }
 0x1a3   :  { %560 = vsyncpa [#allocation3 + $0x1], 1 }

</bundles_post_ra>
